<compile_context>
chip_gen: v7x
topology: tpu7x:2x2x1
jax: 0.10.0
libtpu: 0.0.40
codegen_flags: <defaults>
</compile_context>

<pallas_src>
import jax
import jax.numpy as jnp
from jax.experimental import pallas as pl
from jax.experimental.pallas import tpu as pltpu

# ---- small synthetic config (mirrors args in MultimodalConcatBertClf.__init__) ----
BATCH = 2
SEQ_LEN = 8
VOCAB_SZ = 64
HIDDEN_SZ = 32          # args.hidden_sz        (BERT pooled-output dim)
IMG_HIDDEN_SZ = 16      # args.img_hidden_sz
NUM_IMAGE_EMBEDS = 2    # args.num_image_embeds
IMG_C, IMG_H, IMG_W = 3, 16, 16
CLF_HIDDEN = 32         # args.hidden = [32]    (one hidden classifier layer)
N_CLASSES = 3           # len(args.labels)
BN_EPS = 1e-5

# ---- derived layout constants ----
B_PAD = 8                                            # batch padded to 8 sublanes
PIX_PER_BAND = (IMG_H // NUM_IMAGE_EMBEDS) * IMG_W   # 128 -> lane axis of image input
IMG_FEAT = NUM_IMAGE_EMBEDS * IMG_C                  # 6 band-mean features
IMG_FEAT_PAD = 8                                     # padded to 8 sublanes
OUT_PAD = 128                                        # lane-dense logits tile
WA = max(HIDDEN_SZ, CLF_HIDDEN)                      # column width of packed buffer A

# packed parameter buffer A (width WA): row layout
ROW_WP = 0                                           # wp          [HIDDEN_SZ, HIDDEN_SZ]
ROW_W1T = ROW_WP + HIDDEN_SZ                         # w1_txt'     [HIDDEN_SZ, CLF_HIDDEN]  (BN folded)
ROW_WIMG = ROW_W1T + HIDDEN_SZ                       # w_img_fold  [IMG_FEAT_PAD, CLF_HIDDEN]
ROW_BP = ROW_WIMG + IMG_FEAT_PAD                     # bp          [1, HIDDEN_SZ]
ROW_B1 = ROW_BP + 1                                  # b1_total    [1, CLF_HIDDEN]
PA_ROWS = ((ROW_B1 + 1 + 7) // 8) * 8                # pad rows to multiple of 8

# packed parameter buffer B (width OUT_PAD): rows 0:CLF_HIDDEN = w2 (zero-padded cols),
# row CLF_HIDDEN = b2 (zero-padded).
PB_ROWS = ((CLF_HIDDEN + 1 + 7) // 8) * 8


def _mm_concat_bert_kernel(emb_ref, mask_ref, img_ref, pa_ref, pb_ref, out_ref):
    # --- simplified BertEncoder: masked mean over seq + pooler (Linear + tanh) ---
    # TODO(synk): full multi-layer BERT transformer stack not reproduced (no checkpoint);
    #             synthetic pooler keeps the [B, hidden_sz] interface.
    emb = emb_ref[...]                                   # [Bp, S, H]
    m = mask_ref[...]                                    # [Bp, S]
    msum = jnp.sum(emb * m[:, :, None], axis=1)          # [Bp, H]   (sublane reduce)
    denom = jnp.maximum(jnp.sum(m, axis=1, keepdims=True), 1.0)
    pooled = msum / denom

    pa = pa_ref[...]                                     # single packed param load
    wp = pa[ROW_WP:ROW_WP + HIDDEN_SZ, :HIDDEN_SZ]
    bp = pa[ROW_BP:ROW_BP + 1, :HIDDEN_SZ]
    txt = jnp.tanh(jnp.dot(pooled, wp, preferred_element_type=jnp.float32) + bp)

    # --- simplified ImageEncoder (per-band spatial mean) fused with clf Linear #1 ---
    # TODO(synk): ResNet-152 backbone not reproduced; synthetic band pooling keeps the
    #             [B, num_image_embeds, img_hidden_sz] interface before flatten(1).
    # img_ref is [Bp, IMG_FEAT_PAD, P=128]: one clean XLU lane reduce per row.
    means = jnp.mean(img_ref[...], axis=-1)              # [Bp, IMG_FEAT_PAD]

    # torch.cat([txt, img_flat], -1) @ W1 == txt @ W1_txt + img_flat @ W1_img;
    # ImageEncoder Linear + eval BatchNorm are pre-folded into w1t / wimg / b1.
    w1t = pa[ROW_W1T:ROW_W1T + HIDDEN_SZ, :CLF_HIDDEN]
    wimg = pa[ROW_WIMG:ROW_WIMG + IMG_FEAT_PAD, :CLF_HIDDEN]
    b1 = pa[ROW_B1:ROW_B1 + 1, :CLF_HIDDEN]
    h = (jnp.dot(txt, w1t, preferred_element_type=jnp.float32)
         + jnp.dot(means, wimg, preferred_element_type=jnp.float32)
         + b1)

    # ReLU; Dropout is identity in eval.
    # TODO(synk): train-mode Dropout RNG / batch-statistics BatchNorm not implemented.
    h = jnp.maximum(h, 0.0)

    # --- final Linear -> logits, lane-dense [Bp, 128] store (classes zero-padded) ---
    pb = pb_ref[...]
    w2 = pb[:CLF_HIDDEN, :]
    b2 = pb[CLF_HIDDEN:CLF_HIDDEN + 1, :]
    out_ref[...] = jnp.dot(h, w2, preferred_element_type=jnp.float32) + b2


def multimodal_concat_bert_clf(txt, mask, segment, img_nchw, params):
    """Forward pass. txt/mask/segment: int [B, S]; img_nchw: float [B, C, H, W]."""
    b = txt.shape[0]
    assert b <= B_PAD

    # ---- glue (plain JAX): gathers, layout, weight folding, packing ----
    emb = params["tok_emb"][txt] + params["seg_emb"][segment]      # [B, S, H]
    maskf = mask.astype(jnp.float32)

    # image: NCHW -> [B, N*C, P] with P = (H/N)*W = 128 on the lane axis
    c, ih, iw = img_nchw.shape[1], img_nchw.shape[2], img_nchw.shape[3]
    band_h = ih // NUM_IMAGE_EMBEDS
    img = img_nchw.reshape(b, c, NUM_IMAGE_EMBEDS, band_h, iw)
    img = jnp.transpose(img, (0, 2, 1, 3, 4)).reshape(b, NUM_IMAGE_EMBEDS * c, band_h * iw)

    # pad batch to 8 sublanes; pad image feature rows to 8 (zero rows -> zero means)
    emb_p = jnp.zeros((B_PAD,) + emb.shape[1:], jnp.float32).at[:b].set(emb)
    mask_p = jnp.zeros((B_PAD, maskf.shape[1]), jnp.float32).at[:b].set(maskf)
    img_p = jnp.zeros((B_PAD, IMG_FEAT_PAD, PIX_PER_BAND), jnp.float32)
    img_p = img_p.at[:b, :NUM_IMAGE_EMBEDS * c].set(img)

    # fold eval BatchNorm into Linear #1:  W1' = W1 * s,  b1' = (b1 - mu)*s + beta
    s = params["gamma"] * jax.lax.rsqrt(params["var"] + BN_EPS)            # [1, CH]
    w1t_f = params["w1t"] * s                                              # [H, CH]
    w1i_f = params["w1i"].reshape(NUM_IMAGE_EMBEDS * IMG_HIDDEN_SZ, CLF_HIDDEN) * s
    w1i_f3 = w1i_f.reshape(NUM_IMAGE_EMBEDS, IMG_HIDDEN_SZ, CLF_HIDDEN)
    # fold ImageEncoder Linear (wi, bi) into the image branch of Linear #1
    wimg = jnp.einsum("cj,njk->nck", params["wi"], w1i_f3)                 # [N, C, CH]
    wimg = wimg.reshape(NUM_IMAGE_EMBEDS * IMG_C, CLF_HIDDEN)              # [N*C, CH]
    b_img = jnp.einsum("j,njk->k", params["bi"][0], w1i_f3)                # [CH]
    b1_total = (params["b1"] - params["mu"]) * s + params["beta"] + b_img[None, :]

    # pack all small params into two contiguous VMEM buffers (2 DMAs total)
    pa = jnp.zeros((PA_ROWS, WA), jnp.float32)
    pa = pa.at[ROW_WP:ROW_WP + HIDDEN_SZ, :HIDDEN_SZ].set(params["wp"])
    pa = pa.at[ROW_W1T:ROW_W1T + HIDDEN_SZ, :CLF_HIDDEN].set(w1t_f)
    pa = pa.at[ROW_WIMG:ROW_WIMG + NUM_IMAGE_EMBEDS * IMG_C, :CLF_HIDDEN].set(wimg)
    pa = pa.at[ROW_BP, :HIDDEN_SZ].set(params["bp"][0])
    pa = pa.at[ROW_B1, :CLF_HIDDEN].set(b1_total[0])

    pb = jnp.zeros((PB_ROWS, OUT_PAD), jnp.float32)
    pb = pb.at[:CLF_HIDDEN, :N_CLASSES].set(params["w2"])
    pb = pb.at[CLF_HIDDEN, :N_CLASSES].set(params["b2"][0])

    vmem = pl.BlockSpec(memory_space=pltpu.MemorySpace.VMEM)
    out = pl.pallas_call(
        _mm_concat_bert_kernel,
        out_shape=jax.ShapeDtypeStruct((B_PAD, OUT_PAD), jnp.float32),
        in_specs=[vmem] * 5,
        out_specs=vmem,
    )(emb_p, mask_p, img_p, pa, pb)
    # TODO(synk): at production batch sizes, add a batch grid with
    #             dimension_semantics=("parallel",) to shard across v7x's 2 TCs.
    return out[:b, :N_CLASSES]


def init_params(key):
    ks = jax.random.split(key, 15)

    def u(k, shape, scale=0.1):
        return (jax.random.uniform(k, shape, jnp.float32) - 0.5) * 2.0 * scale

    return dict(
        tok_emb=u(ks[0], (VOCAB_SZ, HIDDEN_SZ)),
        seg_emb=u(ks[1], (2, HIDDEN_SZ)),
        wp=u(ks[2], (HIDDEN_SZ, HIDDEN_SZ)),
        bp=u(ks[3], (1, HIDDEN_SZ)),
        wi=u(ks[4], (IMG_C, IMG_HIDDEN_SZ)),
        bi=u(ks[5], (1, IMG_HIDDEN_SZ)),
        w1t=u(ks[6], (HIDDEN_SZ, CLF_HIDDEN)),
        w1i=u(ks[7], (NUM_IMAGE_EMBEDS, IMG_HIDDEN_SZ, CLF_HIDDEN)),
        b1=u(ks[8], (1, CLF_HIDDEN)),
        gamma=1.0 + u(ks[9], (1, CLF_HIDDEN)),
        beta=u(ks[10], (1, CLF_HIDDEN)),
        mu=u(ks[11], (1, CLF_HIDDEN)),
        var=0.5 + jax.random.uniform(ks[12], (1, CLF_HIDDEN), jnp.float32),
        w2=u(ks[13], (CLF_HIDDEN, N_CLASSES)),
        b2=u(ks[14], (1, N_CLASSES)),
    )


def reference(txt, mask, segment, img_nchw, params):
    """Pure-JAX reference using explicit cat/flatten and un-folded BN (matches PyTorch ops)."""
    emb = params["tok_emb"][txt] + params["seg_emb"][segment]
    maskf = mask.astype(jnp.float32)
    pooled = (emb * maskf[..., None]).sum(1) / jnp.maximum(maskf.sum(1, keepdims=True), 1.0)
    txt_f = jnp.tanh(pooled @ params["wp"] + params["bp"])
    img = jnp.transpose(img_nchw, (0, 2, 3, 1))
    b, ih, iw, c = img.shape
    bands = img.reshape(b, NUM_IMAGE_EMBEDS, (ih // NUM_IMAGE_EMBEDS) * iw, c).mean(axis=2)
    img_emb = bands @ params["wi"] + params["bi"]                    # [B, N, Dimg]
    img_flat = img_emb.reshape(b, -1)                                # torch.flatten(img, 1)
    feat = jnp.concatenate([txt_f, img_flat], axis=-1)               # torch.cat([txt, img], -1)
    w1 = jnp.concatenate([params["w1t"], params["w1i"].reshape(-1, CLF_HIDDEN)], axis=0)
    h = feat @ w1 + params["b1"]
    h = params["gamma"] * (h - params["mu"]) * jax.lax.rsqrt(params["var"] + BN_EPS) + params["beta"]
    h = jnp.maximum(h, 0.0)
    return h @ params["w2"] + params["b2"]


if __name__ == "__main__":
    key = jax.random.PRNGKey(0)
    kp, kt, ks, ki = jax.random.split(key, 4)
    params = init_params(kp)

    txt = jax.random.randint(kt, (BATCH, SEQ_LEN), 0, VOCAB_SZ, dtype=jnp.int32)
    segment = jax.random.randint(ks, (BATCH, SEQ_LEN), 0, 2, dtype=jnp.int32)
    img = jax.random.normal(ki, (BATCH, IMG_C, IMG_H, IMG_W), jnp.float32)
    lens = jnp.array([SEQ_LEN, SEQ_LEN - 3], jnp.int32)              # variable lengths
    mask = (jnp.arange(SEQ_LEN)[None, :] < lens[:, None]).astype(jnp.int32)

    out = multimodal_concat_bert_clf(txt, mask, segment, img, params)
    out = jax.block_until_ready(out)

    ref = reference(txt, mask, segment, img, params)
    assert out.shape == (BATCH, N_CLASSES)
    assert jnp.allclose(out, ref, atol=1e-4, rtol=1e-4), (out, ref)
    print("KERNEL_OK")
</pallas_src>

<mosaic_0001>
module attributes {stable_mosaic.version = 11 : i64} {
  func.func @_mm_concat_bert_kernel(%arg0: memref<8x8x32xf32, #tpu.memory_space<vmem>>, %arg1: memref<8x8xf32, #tpu.memory_space<vmem>>, %arg2: memref<8x8x128xf32, #tpu.memory_space<vmem>>, %arg3: memref<80x32xf32, #tpu.memory_space<vmem>>, %arg4: memref<40x128xf32, #tpu.memory_space<vmem>>, %arg5: memref<8x128xf32, #tpu.memory_space<vmem>>) attributes {dimension_semantics = [], scalar_prefetch = 0 : i64, scratch_operands = 0 : i64, tpu.core_type = #tpu.core_type<tc>} {
    %c0 = arith.constant 0 : index
    %c0_0 = arith.constant 0 : index
    %c0_1 = arith.constant 0 : index
    %0 = vector.load %arg0[%c0, %c0_0, %c0_1] : memref<8x8x32xf32, #tpu.memory_space<vmem>>, vector<8x8x32xf32>
    %c0_2 = arith.constant 0 : index
    %c0_3 = arith.constant 0 : index
    %1 = vector.load %arg1[%c0_2, %c0_3] : memref<8x8xf32, #tpu.memory_space<vmem>>, vector<8x8xf32>
    %2 = vector.shape_cast %1 : vector<8x8xf32> to vector<8x8x1xf32>
    %3 = vector.broadcast %2 : vector<8x8x1xf32> to vector<8x8x32xf32>
    %4 = arith.mulf %0, %3 : vector<8x8x32xf32>
    %cst = arith.constant dense<0.000000e+00> : vector<8x32xf32>
    %5 = vector.multi_reduction <add>, %4, %cst [1] : vector<8x8x32xf32> to vector<8x32xf32>
    %cst_4 = arith.constant dense<0.000000e+00> : vector<8xf32>
    %6 = vector.multi_reduction <add>, %1, %cst_4 [1] : vector<8x8xf32> to vector<8xf32>
    %7 = vector.shape_cast %6 : vector<8xf32> to vector<8x1xf32>
    %cst_5 = arith.constant 1.000000e+00 : f32
    %8 = vector.broadcast %cst_5 : f32 to vector<8x1xf32>
    %9 = arith.maximumf %7, %8 : vector<8x1xf32>
    %10 = vector.broadcast %9 : vector<8x1xf32> to vector<8x32xf32>
    %11 = arith.divf %5, %10 : vector<8x32xf32>
    %c0_6 = arith.constant 0 : index
    %c0_7 = arith.constant 0 : index
    %12 = vector.load %arg3[%c0_6, %c0_7] : memref<80x32xf32, #tpu.memory_space<vmem>>, vector<80x32xf32>
    %13 = vector.extract_strided_slice %12 {offsets = [0, 0], sizes = [32, 32], strides = [1, 1]} : vector<80x32xf32> to vector<32x32xf32>
    %14 = vector.extract_strided_slice %12 {offsets = [72, 0], sizes = [1, 32], strides = [1, 1]} : vector<80x32xf32> to vector<1x32xf32>
    %cst_8 = arith.constant dense<0.000000e+00> : vector<8x32xf32>
    %15 = tpu.matmul %11, %13, %cst_8 {dimension_numbers = #tpu.dot_dimension_numbers<[1], [0], [0], [1], [0, 0, 1, 1], [], []>} : vector<8x32xf32>, vector<32x32xf32>, vector<8x32xf32> -> vector<8x32xf32>
    %16 = vector.broadcast %14 : vector<1x32xf32> to vector<8x32xf32>
    %17 = arith.addf %15, %16 : vector<8x32xf32>
    %18 = math.tanh %17 : vector<8x32xf32>
    %c0_9 = arith.constant 0 : index
    %c0_10 = arith.constant 0 : index
    %c0_11 = arith.constant 0 : index
    %19 = vector.load %arg2[%c0_9, %c0_10, %c0_11] : memref<8x8x128xf32, #tpu.memory_space<vmem>>, vector<8x8x128xf32>
    %cst_12 = arith.constant dense<0.000000e+00> : vector<8x8xf32>
    %20 = vector.multi_reduction <add>, %19, %cst_12 [2] : vector<8x8x128xf32> to vector<8x8xf32>
    %cst_13 = arith.constant 1.280000e+02 : f32
    %21 = vector.broadcast %cst_13 : f32 to vector<8x8xf32>
    %22 = arith.divf %20, %21 : vector<8x8xf32>
    %23 = vector.extract_strided_slice %12 {offsets = [32, 0], sizes = [32, 32], strides = [1, 1]} : vector<80x32xf32> to vector<32x32xf32>
    %24 = vector.extract_strided_slice %12 {offsets = [64, 0], sizes = [8, 32], strides = [1, 1]} : vector<80x32xf32> to vector<8x32xf32>
    %25 = vector.extract_strided_slice %12 {offsets = [73, 0], sizes = [1, 32], strides = [1, 1]} : vector<80x32xf32> to vector<1x32xf32>
    %cst_14 = arith.constant dense<0.000000e+00> : vector<8x32xf32>
    %26 = tpu.matmul %18, %23, %cst_14 {dimension_numbers = #tpu.dot_dimension_numbers<[1], [0], [0], [1], [0, 0, 1, 1], [], []>} : vector<8x32xf32>, vector<32x32xf32>, vector<8x32xf32> -> vector<8x32xf32>
    %cst_15 = arith.constant dense<0.000000e+00> : vector<8x32xf32>
    %27 = tpu.matmul %22, %24, %cst_15 {dimension_numbers = #tpu.dot_dimension_numbers<[1], [0], [0], [1], [0, 0, 1, 1], [], []>} : vector<8x8xf32>, vector<8x32xf32>, vector<8x32xf32> -> vector<8x32xf32>
    %28 = arith.addf %26, %27 : vector<8x32xf32>
    %29 = vector.broadcast %25 : vector<1x32xf32> to vector<8x32xf32>
    %30 = arith.addf %28, %29 : vector<8x32xf32>
    %cst_16 = arith.constant 0.000000e+00 : f32
    %31 = vector.broadcast %cst_16 : f32 to vector<8x32xf32>
    %32 = arith.maximumf %30, %31 : vector<8x32xf32>
    %c0_17 = arith.constant 0 : index
    %c0_18 = arith.constant 0 : index
    %33 = vector.load %arg4[%c0_17, %c0_18] : memref<40x128xf32, #tpu.memory_space<vmem>>, vector<40x128xf32>
    %34 = vector.extract_strided_slice %33 {offsets = [0, 0], sizes = [32, 128], strides = [1, 1]} : vector<40x128xf32> to vector<32x128xf32>
    %35 = vector.extract_strided_slice %33 {offsets = [32, 0], sizes = [1, 128], strides = [1, 1]} : vector<40x128xf32> to vector<1x128xf32>
    %cst_19 = arith.constant dense<0.000000e+00> : vector<8x128xf32>
    %36 = tpu.matmul %32, %34, %cst_19 {dimension_numbers = #tpu.dot_dimension_numbers<[1], [0], [0], [1], [0, 0, 1, 1], [], []>} : vector<8x32xf32>, vector<32x128xf32>, vector<8x128xf32> -> vector<8x128xf32>
    %37 = vector.broadcast %35 : vector<1x128xf32> to vector<8x128xf32>
    %38 = arith.addf %36, %37 : vector<8x128xf32>
    %c0_20 = arith.constant 0 : index
    %c0_21 = arith.constant 0 : index
    %39 = vector.load %arg5[%c0_20, %c0_21] : memref<8x128xf32, #tpu.memory_space<vmem>>, vector<8x128xf32>
    tpu.vector_store %arg5[%c0_20, %c0_21], %38 {strides = array<i32>} : memref<8x128xf32, #tpu.memory_space<vmem>>, vector<8x128xf32>,
    return
  }
}

</mosaic_0001>

<bundles_post_ra>
// kernel: tpu_custom_call.1
= control target key start
LH: loop header
LB: loop body
LE: loop exit
PB: predicated region body
PF: predicated region fallthrough
CT: control target
= control target key end

     0   :  { %10 = vsyncpa [#allocation3], 0  ;;  %s1004_s0 = inlined_call_operand.vmem [shape: f32[8,8,32], index: 0, kind: input, shape index: {}]   ;;  %s1005_s1 = inlined_call_operand.vmem [shape: f32[8,8], index: 1, kind: input, shape index: {}]   ;;  %s1006_s2 = inlined_call_operand.hbm [shape: f32[8,8,128], index: 2, kind: input, shape index: {}]   ;;  %s1007_s3 = inlined_call_operand.vmem [shape: f32[80,32], index: 3, kind: input, shape index: {}]   ;;  %s1008_s4 = inlined_call_operand.vmem [shape: f32[40,128], index: 4, kind: input, shape index: {}]   ;;  %s1009_s5 = inlined_call_operand.hbm [shape: f32[8,128], index: 5, kind: output, shape index: {}]  }
   0x1   :  { %11 = vsyncpa [#allocation4], 0  ;;  %s799_s18 = smov [#allocation2]   ;;  %s751_s22 = scalar_lea.hbm %s1006_s2, 1024 }
   0x2   :  { %s21_s19 = sshll.u32 %s799_s18, 4  ;;  %p752_p0 = scmp.ne.s32.totalorder %s1006_s2, %s751_s22  ;;  %s22_s19 = int_to_ptr.vmem [resolvable:$true] %s21_s19 }
   0x3   :  { %p755_p1 = scmp.lt.u32.totalorder %s751_s22, %s1006_s2 }
   0x5   :  { %p757_p2 = pnand %p755_p1, %p752_p0 }
   0x7   :  { %760 = shalt.err (!%p757_p2)
}
   0x8   :  { %s761_s27 = scalar_lea.vmem %s22_s19, 1024  ;;  %p766_p4 = scmp.lt.s32.totalorder %s22_s19, %s22_s19 }
   0x9   :  { %p762_p3 = scmp.ne.s32.totalorder %s22_s19, %s761_s27  ;;  %p767_p5 = scmp.lt.s32.totalorder %s761_s27, %s761_s27 }
   0xb   :  { %p768_p6 = por %p767_p5, %p766_p4 }
   0xd   :  { %p769_p7 = pnand %p768_p6, %p762_p3 }
   0xf   :  { %772 = shalt.err (!%p769_p7)
}
  0x10   :  { %s800_s28 = smov 128   ;;  %s801_s29 = smov 8  }
  0x11   :  { %27 = dma.hbm_to_vmem [thread:$0]  %s1006_s2, 1024, %s22_s19, [#allocation3], %s800_s28, %s800_s28, %s801_s29  }
  0x12   :  { %795 = dma.done.wait [#allocation3], 1024  }
  0x13   :  { %796 = vsyncadd [#allocation3], 4294966272  ;;  %v44_v0 = vlaneseq  ;;  %vm165_vm0 = vcmask 64512   ;;  %v43_v4 = vld [vmem:[%s1005_s1] sm:$0xff]  ;;  %v203_v21 = vld [vmem:[%s1007_s3 + $0x8] sm:$0xff]  ;;  %v802_v23 = vmov 0.0|0.0  }
  0x14   :  { %v166_v5 = vsel %vm165_vm0, %v43_v4, 0.0  ;;  %v202_v20 = vld [vmem:[%s1007_s3] sm:$0xff]  ;;  %708 = vmatprep.subr.bf16.mxu0 %v802_v23  ;;  %v204_v24 = vld [vmem:[%s1007_s3 + $0x10] sm:$0xff]  ;;  %v205_v25 = vld [vmem:[%s1007_s3 + $0x18] sm:$0xff]  ;;  %vm803_vm1 = vmmov 0   ;;  %v804_v27 = vmov 0.0  }
  0x15   :  { %v848_v1 = vshrl.u32 %v44_v0, 7  ;;  %167 = vadd.xlane.f32.xlu0 %v166_v5  ;;  %v709_v22 = vpack.c.bf16 %v203_v21, %v202_v20  ;;  %v712_v26 = vpack.c.bf16 %v205_v25, %v204_v24  ;;  %678 = vmatprep.mubr.msk.f32.mxu0 %vm803_vm1, %v804_v27  ;;  %v360_v28 = vand.u32 127, %v44_v0  ;;  %v318_v30 = vld [vmem:[#allocation2] sm:$0xff]  ;;  %v320_v31 = vld [vmem:[#allocation2 + $0x10] sm:$0xff]  ;;  %v319_v32 = vld [vmem:[#allocation2 + $0x8] sm:$0xff]  ;;  %s805_s24 = smov [#allocation5]  }
  0x16   :  { %681 = vmatprep.subr.mxu1 %v804_v27  ;;  %683 = vmatprep.mubr.msk.f32.mxu1 %vm803_vm1, %v804_v27  ;;  %v321_v33 = vld [vmem:[#allocation2 + $0x18] sm:$0xff]  ;;  %v322_v34 = vld [vmem:[#allocation2 + $0x20] sm:$0xff]  ;;  %v323_v35 = vld [vmem:[#allocation2 + $0x28] sm:$0xff]  ;;  %vm108_vm2 = vcmask 261120   ;;  %vm225_vm3 = vcmask 1041409   ;;  %vm228_vm4 = vcmask 1042434  }
  0x17   :  { %v60_v2 = vsub.s32 2, %v848_v1  ;;  %v852_v3 = vsub.s32 0, %v848_v1  ;;  %v67_v8 = vsub.s32 3, %v848_v1  ;;  %v74_v10 = vsub.s32 4, %v848_v1  ;;  %710 = vmatpush3.bf16.msra.mxu0 %v709_v22  ;;  %v324_v36 = vld [vmem:[#allocation2 + $0x30] sm:$0xff]  ;;  %v325_v37 = vld [vmem:[#allocation2 + $0x38] sm:$0xff] }
  0x18   :  { %v81_v12 = vsub.s32 5, %v848_v1  ;;  %v88_v14 = vsub.s32 6, %v848_v1  ;;  %v53_v15 = vsub.s32 1, %v848_v1  ;;  %v95_v17 = vsub.s32 7, %v848_v1  ;;  %711 = vmatprep.subr.bf16.mxu0 %v802_v23  ;;  %v210_v38 = vld [vmem:[%s1007_s3 + $0x40] sm:$0xff]  ;;  %v37_v42 = vld [vmem:[%s1004_s0 + $0x10] sm:$0xff] }
  0x19   :  { %v61_v6 = vrot.slane %v43_v4, %v60_v2  ;;  %v47_v7 = vrot.slane %v43_v4, %v852_v3  ;;  %v68_v9 = vrot.slane %v43_v4, %v67_v8  ;;  %v75_v11 = vrot.slane %v43_v4, %v74_v10  ;;  %682 = vmatpush3.msra.mxu1 %v210_v38  ;;  %v35_v45 = vld [vmem:[%s1004_s0] sm:$0xff]  ;;  %v38_v46 = vld [vmem:[%s1004_s0 + $0x18] sm:$0xff]  ;;  %v40_v50 = vld [vmem:[%s1004_s0 + $0x28] sm:$0xff]  ;;  %s640_s25 = sshll.u32 %s805_s24, 4  ;;  %s641_s25 = int_to_ptr.vmem [resolvable:$true] %s640_s25 }
  0x1a   :  { %v82_v13 = vrot.slane %v43_v4, %v81_v12  ;;  %v89_v16 = vrot.slane %v43_v4, %v88_v14  ;;  %v54_v18 = vrot.slane %v43_v4, %v53_v15  ;;  %v96_v19 = vrot.slane %v43_v4, %v95_v17  ;;  %714 = vmatprep.subr.bf16.mxu1 %v802_v23  ;;  %v39_v47 = vld [vmem:[%s1004_s0 + $0x20] sm:$0xff]  ;;  %v41_v54 = vld [vmem:[%s1004_s0 + $0x30] sm:$0xff]  ;;  %v42_v62 = vld [vmem:[%s1004_s0 + $0x38] sm:$0xff]  ;;  %s773_s26 = scalar_lea.vmem %s641_s25, 128  ;;  %p778_p9 = scmp.lt.s32.totalorder %s641_s25, %s641_s25 }
  0x1b   :  { %63 = vbcast.lane.b32.xlu1 %v61_v6, 256  ;;  %713 = vmatpush3.bf16.msra.mxu0 %v712_v26  ;;  %v888_v29 = vsub.s32 %v360_v28, %v848_v1  ;;  %v36_v20 = vld [vmem:[%s1004_s0 + $0x8] sm:$0xff]  ;;  %vm231_vm5 = vcmask 1043459   ;;  %vm234_vm6 = vcmask 1044484   ;;  %vm237_vm7 = vcmask 1045509   ;;  %p774_p8 = scmp.ne.s32.totalorder %s641_s25, %s773_s26  ;;  %p779_p10 = scmp.lt.s32.totalorder %s773_s26, %s773_s26 }
  0x1c   :  { %720 = vmatprep.subr.bf16.mxu0 %v802_v23  ;;  %vm240_vm8 = vcmask 1046534   ;;  %vm243_vm9 = vcmask 1047559  }
  0x1d   :  { %p780_p11 = por %p779_p10, %p778_p9 }
  0x1f   :  { %49 = vbcast.lane.b32.xlu1 %v47_v7, 256  ;;  %p781_p12 = pnand %p780_p11, %p774_p8 }
  0x23   :  { %70 = vbcast.lane.b32.xlu1 %v68_v9, 256 }
  0x27   :  { %77 = vbcast.lane.b32.xlu1 %v75_v11, 256 }
  0x2b   :  { %84 = vbcast.lane.b32.xlu1 %v82_v13, 256  ;;  %56 = vbcast.lane.b32.xlu0 %v54_v18, 256 }
  0x2f   :  { %91 = vbcast.lane.b32.xlu1 %v89_v16, 256 }
  0x33   :  { %98 = vbcast.lane.b32.xlu1 %v96_v19, 256 }
  0x4a   :  { %326 = vadd.xlane.f32.xlu0 %v318_v30 }
  0x4e   :  { %330 = vadd.xlane.f32.xlu0 %v320_v31 }
  0x52   :  { %332 = vadd.xlane.f32.xlu0 %v321_v33 }
  0x56   :  { %336 = vadd.xlane.f32.xlu0 %v323_v35 }
  0x57   :  { %328 = vadd.xlane.f32.xlu1 %v319_v32 }
  0x5a   :  { %340 = vadd.xlane.f32.xlu0 %v325_v37 }
  0x5b   :  { %334 = vadd.xlane.f32.xlu1 %v322_v34 }
  0x5f   :  { %338 = vadd.xlane.f32.xlu1 %v324_v36 }
  0x8d   :  { %v64_v39 = vpop.permute.xlu1 %63 }
  0x8e   :  { %v102_v44 = vmul.f32 %v64_v39, %v37_v42 }
  0x90   :  { %v123_v51 = vsel %vm108_vm2, %v102_v44, 0.0 }
  0x91   :  { %v50_v40 = vpop.permute.xlu1 %49  ;;  %v124_v56 = vrot.slane %v123_v51, 4 }
  0x92   :  { %v100_v48 = vmul.f32 %v50_v40, %v35_v45 }
  0x93   :  { %v125_v4 = vadd.f32 %v124_v56, %v123_v51 }
  0x94   :  { %v109_v57 = vsel %vm108_vm2, %v100_v48, 0.0 }
  0x95   :  { %v71_v41 = vpop.permute.xlu1 %70  ;;  %v110_v63 = vrot.slane %v109_v57, 4  ;;  %v126_v16 = vrot.slane %v125_v4, 2 }
  0x96   :  { %v103_v52 = vmul.f32 %v71_v41, %v38_v46 }
  0x97   :  { %v111_v12 = vadd.f32 %v110_v63, %v109_v57  ;;  %v127_v44 = vadd.f32 %v126_v16, %v125_v4 }
  0x98   :  { %v130_v59 = vsel %vm108_vm2, %v103_v52, 0.0 }
  0x99   :  { %v78_v43 = vpop.permute.xlu1 %77  ;;  %v131_v5 = vrot.slane %v130_v59, 4  ;;  %v112_v32 = vrot.slane %v111_v12, 2 }
  0x9a   :  { %v104_v53 = vmul.f32 %v78_v43, %v39_v47 }
  0x9b   :  { %v132_v17 = vadd.f32 %v131_v5, %v130_v59  ;;  %v113_v47 = vadd.f32 %v112_v32, %v111_v12 }
  0x9c   :  { %v137_v60 = vsel %vm108_vm2, %v104_v53, 0.0  ;;  %v128_v53 = vrot.slane %v127_v44, 1 }
  0x9d   :  { %v85_v49 = vpop.permute.xlu1 %84  ;;  %v138_v6 = vrot.slane %v137_v60, 4  ;;  %v133_v35 = vrot.slane %v132_v17, 2 }
  0x9e   :  { %v105_v55 = vmul.f32 %v85_v49, %v40_v50  ;;  %v129_v4 = vadd.f32 %v128_v53, %v127_v44 }
  0x9f   :  { %v139_v18 = vadd.f32 %v138_v6, %v137_v60  ;;  %v134_v45 = vadd.f32 %v133_v35, %v132_v17 }
  0xa0   :  { %v144_v0 = vsel %vm108_vm2, %v105_v55, 0.0 }
  0xa1   :  { %v92_v58 = vpop.permute.xlu1 %91  ;;  %v145_v10 = vrot.slane %v144_v0, 4  ;;  %v140_v36 = vrot.slane %v139_v18, 2  ;;  %v135_v55 = vrot.slane %v134_v45, 1 }
  0xa2   :  { %v106_v61 = vmul.f32 %v92_v58, %v41_v54  ;;  %v168_v11 = vpop.xlane.xlu0 %167  ;;  %v114_v58 = vrot.slane %v113_v47, 1 }
  0xa3   :  { %v169_v13 = vmax.f32 %v168_v11, 1.0  ;;  %v146_v26 = vadd.f32 %v145_v10, %v144_v0  ;;  %v141_v48 = vadd.f32 %v140_v36, %v139_v18  ;;  %v136_v6 = vadd.f32 %v135_v55, %v134_v45 }
  0xa4   :  { %v151_v2 = vsel %vm108_vm2, %v106_v61, 0.0 }
  0xa5   :  { %v99_v7 = vpop.permute.xlu1 %98  ;;  %v152_v8 = vrot.slane %v151_v2, 4  ;;  %v171_v22 = vrot.slane %v169_v13, 1  ;;  %v172_v24 = vrot.slane %v169_v13, 2  ;;  %v173_v25 = vrot.slane %v169_v13, 3 }
  0xa6   :  { %v107_v9 = vmul.f32 %v99_v7, %v42_v62  ;;  %733 = vrcp.f32 %v169_v13  ;;  %v57_v30 = vpop.permute.xlu0 %56  ;;  %v174_v31 = vrot.slane %v169_v13, 4  ;;  %v175_v34 = vrot.slane %v169_v13, 5 }
  0xa7   :  { %v153_v21 = vadd.f32 %v152_v8, %v151_v2  ;;  %735 = vrcp.f32 %v171_v22  ;;  %v101_v33 = vmul.f32 %v57_v30, %v36_v20  ;;  %v176_v37 = vrot.slane %v169_v13, 6 }
  0xa8   :  { %v158_v14 = vsel %vm108_vm2, %v107_v9, 0.0  ;;  %737 = vrcp.f32 %v172_v24  ;;  %v177_v40 = vrot.slane %v169_v13, 7  ;;  %v147_v41 = vrot.slane %v146_v26, 2 }
  0xa9   :  { %v159_v19 = vrot.slane %v158_v14, 4  ;;  %v154_v38 = vrot.slane %v153_v21, 2  ;;  %v116_v39 = vsel %vm108_vm2, %v101_v33, 0.0  ;;  %739 = vrcp.f32 %v173_v25 }
  0xaa   :  { %v117_v43 = vrot.slane %v116_v39, 4  ;;  %741 = vrcp.f32 %v174_v31  ;;  %v148_v50 = vadd.f32 %v147_v41, %v146_v26  ;;  %v142_v59 = vrot.slane %v141_v48, 1 }
  0xab   :  { %v160_v28 = vadd.f32 %v159_v19, %v158_v14  ;;  %743 = vrcp.f32 %v175_v34  ;;  %v155_v49 = vadd.f32 %v154_v38, %v153_v21  ;;  %v115_v9 = vadd.f32 %v114_v58, %v113_v47 }
  0xac   :  { %v118_v46 = vadd.f32 %v117_v43, %v116_v39  ;;  %745 = vrcp.f32 %v176_v37  ;;  %v149_v62 = vrot.slane %v148_v50, 1  ;;  %v143_v10 = vadd.f32 %v142_v59, %v141_v48 }
  0xad   :  { %v161_v42 = vrot.slane %v160_v28, 2  ;;  %747 = vrcp.f32 %v177_v40  ;;  %v156_v60 = vrot.slane %v155_v49, 1 }
  0xae   :  { %v119_v52 = vrot.slane %v118_v46, 2  ;;  %v150_v14 = vadd.f32 %v149_v62, %v148_v50 }
  0xaf   :  { %v162_v51 = vadd.f32 %v161_v42, %v160_v28  ;;  %v157_v11 = vadd.f32 %v156_v60, %v155_v49 }
  0xb0   :  { %v734_v54 = vpop.eup %733  ;;  %v120_v56 = vadd.f32 %v119_v52, %v118_v46 }
  0xb1   :  { %v736_v57 = vpop.eup %735  ;;  %v163_v63 = vrot.slane %v162_v51, 1  ;;  %v187_v21 = vmul.f32 %v734_v54, %v115_v9 }
  0xb2   :  { %v738_v61 = vpop.eup %737  ;;  %v121_v0 = vrot.slane %v120_v56, 1 }
  0xb3   :  { %v740_v2 = vpop.eup %739  ;;  %v191_v12 = vmul.f32 %v738_v61, %v129_v4  ;;  %v164_v16 = vadd.f32 %v163_v63, %v162_v51 }
  0xb4   :  { %v742_v5 = vpop.eup %741  ;;  %v122_v7 = vadd.f32 %v121_v0, %v120_v56  ;;  %v193_v18 = vmul.f32 %v740_v2, %v136_v6 }
  0xb5   :  { %v744_v8 = vpop.eup %743  ;;  %v195_v20 = vmul.f32 %v742_v5, %v143_v10  ;;  %v227_v26 = vrot.slane %v191_v12, 6  ;;  %v207_v12 = vld [vmem:[%s1007_s3 + $0x28] sm:$0xff] }
  0xb6   :  { %v746_v13 = vpop.eup %745  ;;  %v189_v17 = vmul.f32 %v736_v57, %v122_v7  ;;  %v197_v24 = vmul.f32 %v744_v8, %v150_v14  ;;  %v230_v31 = vrot.slane %v193_v18, 5  ;;  %v209_v14 = vld [vmem:[%s1007_s3 + $0x38] sm:$0xff] }
  0xb7   :  { %v748_v19 = vpop.eup %747  ;;  %v199_v25 = vmul.f32 %v746_v13, %v157_v11  ;;  %v233_v33 = vrot.slane %v195_v20, 4  ;;  %v206_v11 = vld [vmem:[%s1007_s3 + $0x20] sm:$0xff] }
  0xb8   :  { %v224_v22 = vrot.slane %v189_v17, 7  ;;  %v201_v30 = vmul.f32 %v748_v19, %v164_v16  ;;  %v236_v35 = vrot.slane %v197_v24, 3  ;;  %v715_v13 = vpack.c.bf16 %v207_v12, %v206_v11 }
  0xb9   :  { %v239_v37 = vrot.slane %v199_v25, 2  ;;  %v551_v25 = vld [vmem:[%s1008_s4] sm:$0xff] }
  0xba   :  { %v226_v28 = vsel %vm225_vm3, %v224_v22, %v187_v21  ;;  %v242_v39 = vrot.slane %v201_v30, 1  ;;  %v553_v30 = vld [vmem:[%s1008_s4 + $0x10] sm:$0xff] }
  0xbb   :  { %v229_v32 = vsel %vm228_vm4, %v227_v26, %v226_v28  ;;  %v552_v26 = vld [vmem:[%s1008_s4 + $0x8] sm:$0xff] }
  0xbc   :  { %v232_v34 = vsel %vm231_vm5, %v230_v31, %v229_v32  ;;  %v721_v28 = vpack.c.bf16 %v552_v26, %v551_v25  ;;  %v554_v31 = vld [vmem:[%s1008_s4 + $0x18] sm:$0xff] }
  0xbd   :  { %v235_v36 = vsel %vm234_vm6, %v233_v33, %v232_v34  ;;  %v724_v32 = vpack.c.bf16 %v554_v31, %v553_v30 }
  0xbe   :  { %v238_v38 = vsel %vm237_vm7, %v236_v35, %v235_v36 }
  0xbf   :  { %v241_v40 = vsel %vm240_vm8, %v239_v37, %v238_v38 }
  0xc0   :  { %v244_v41 = vsel %vm243_vm9, %v242_v39, %v241_v40  ;;  %v555_v39 = vld [vmem:[%s1008_s4 + $0x20] sm:$0xff] }
  0xc1   :  { %679 = vmatmul.mubr.msk.f32.vlgmr.msra.gmra.mrb[0].mxu0 %vm108_vm2, %v244_v41  ;;  %v559_v40 = vrot.slane %v555_v39, %v852_v3 }
  0xc2   :  { %705 = vmatprep.mubr.msk.f32.mxu0 %vm803_vm1, %v804_v27  ;;  %722 = vmatpush3.bf16.msra.mxu0 %v721_v28 }
  0xc3   :  { %723 = vmatprep.subr.bf16.mxu0 %v802_v23 }
  0xc6   :  { %725 = vmatpush3.bf16.msra.mxu0 %v724_v32 }
  0xd7   :  { %v327_v42 = vpop.xlane.xlu0 %326 }
  0xd8   :  { %v343_v44 = vmul.f32 0.0078125, %v327_v42 }
  0xda   :  { %v364_v48 = vrot.slane %v343_v44, %v888_v29 }
  0xdb   :  { %v331_v43 = vpop.xlane.xlu0 %330 }
  0xdc   :  { %v345_v45 = vmul.f32 0.0078125, %v331_v43 }
  0xde   :  { %v372_v51 = vrot.slane %v345_v45, %v888_v29 }
  0xdf   :  { %v333_v47 = vpop.xlane.xlu0 %332 }
  0xe0   :  { %v346_v50 = vmul.f32 0.0078125, %v333_v47 }
  0xe2   :  { %v376_v53 = vrot.slane %v346_v50, %v888_v29 }
  0xe3   :  { %v337_v55 = vpop.xlane.xlu0 %336 }
  0xe4   :  { %v329_v46 = vpop.xlane.xlu1 %328  ;;  %v348_v58 = vmul.f32 0.0078125, %v337_v55 }
  0xe5   :  { %v344_v49 = vmul.f32 0.0078125, %v329_v46 }
  0xe6   :  { %v384_v62 = vrot.slane %v348_v58, %v888_v29 }
  0xe7   :  { %v368_v52 = vrot.slane %v344_v49, %v888_v29  ;;  %v341_v0 = vpop.xlane.xlu0 %340 }
  0xe8   :  { %v335_v54 = vpop.xlane.xlu1 %334  ;;  %v350_v5 = vmul.f32 0.0078125, %v341_v0 }
  0xe9   :  { %v393_v56 = vsel %vm225_vm3, %v368_v52, %v364_v48  ;;  %v347_v57 = vmul.f32 0.0078125, %v335_v54 }
  0xea   :  { %v394_v59 = vsel %vm228_vm4, %v372_v51, %v393_v56  ;;  %v392_v8 = vrot.slane %v350_v5, %v888_v29 }
  0xeb   :  { %v395_v60 = vsel %vm231_vm5, %v376_v53, %v394_v59  ;;  %v380_v61 = vrot.slane %v347_v57, %v888_v29 }
  0xec   :  { %v339_v63 = vpop.xlane.xlu1 %338 }
  0xed   :  { %v396_v2 = vsel %vm234_vm6, %v380_v61, %v395_v60  ;;  %v349_v4 = vmul.f32 0.0078125, %v339_v63 }
  0xee   :  { %v397_v6 = vsel %vm237_vm7, %v384_v62, %v396_v2 }
  0xef   :  { %v388_v7 = vrot.slane %v349_v4, %v888_v29  ;;  %v208_v29 = vld [vmem:[%s1007_s3 + $0x30] sm:$0xff] }
  0xf0   :  { %v718_v16 = vpack.c.bf16 %v209_v14, %v208_v29 }
  0xf1   :  { %v398_v9 = vsel %vm240_vm8, %v388_v7, %v397_v6 }
  0xf2   :  { %v399_v10 = vsel %vm243_vm9, %v392_v8, %v398_v9 }
  0xf3   :  { %684 = vmatmul.mubr.msk.f32.vlgmr.msra.gmra.mrb[0].mxu1 %vm165_vm0, %v399_v10 }
  0xf4   :  { %694 = vmatprep.mubr.msk.f32.mxu1 %vm803_vm1, %v804_v27  ;;  %716 = vmatpush3.bf16.msra.mxu1 %v715_v13  ;;  %v211_v27 = vld [vmem:[%s1007_s3 + $0x48] sm:$0xff] }
  0xf5   :  { %717 = vmatprep.subr.bf16.mxu1 %v802_v23  ;;  %v215_v17 = vrot.slane %v211_v27, %v852_v3  ;;  %v548_v33 = vrot.slane %v211_v27, %v53_v15 }
  0xf8   :  { %719 = vmatpush3.bf16.msra.mxu1 %v718_v16 }
 0x194   :  { %v313_v18 = vpop.f32.mrb[0].mxu0 }
 0x195   :  { %v314_v19 = vadd.f32 %v313_v18, %v215_v17  ;;  %v680_v20 = vpop.f32.mrb[1].mxu0 }
 0x197   :  { %749 = vtanh.f32 %v314_v19 }
 0x1a1   :  { %v750_v21 = vpop.eup %749 }
 0x1a2   :  { %695 = vmatmul.mubr.msk.f32.vlgmr.msra.gmra.mrb[2].mxu1 %vm108_vm2, %v750_v21 }
 0x1c6   :  { %v468_v22 = vpop.f32.mrb[0].mxu1 }
 0x1c7   :  { %v685_v24 = vpop.f32.mrb[1].mxu1 }
 0x275   :  { %v541_v34 = vpop.f32.mrb[2].mxu1 }
 0x276   :  { %v542_v35 = vadd.f32 %v541_v34, %v468_v22  ;;  %v696_v36 = vpop.f32.mrb[3].mxu1 }
 0x278   :  { %v549_v37 = vadd.f32 %v548_v33, %v542_v35 }
 0x27a   :  { %v550_v38 = vmax.f32 %v549_v37, 0.0 }
 0x27c   :  { %706 = vmatmul.mubr.msk.f32.vlgmr.msra.gmra.mrb[2].mxu0 %vm108_vm2, %v550_v38 }
 0x34f   :  { %v629_v23 = vpop.f32.mrb[2].mxu0 }
 0x350   :  { %v630_v41 = vadd.f32 %v629_v23, %v559_v40  ;;  %v707_v42 = vpop.f32.mrb[3].mxu0 }
 0x352   :  { %633 = vst [vmem:[#allocation5] sm:$0xff] %v630_v41 }
 0x353   :  { %784 = shalt.err (!%p781_p12)
}
 0x354   :  { %s785_s4 = scalar_lea.hbm %s1009_s5, 128 }
 0x355   :  { %p786_p13 = scmp.ne.s32.totalorder %s1009_s5, %s785_s4  ;;  %p789_p0 = scmp.lt.u32.totalorder %s785_s4, %s1009_s5 }
 0x357   :  { %p791_p1 = pnand %p789_p0, %p786_p13 }
 0x359   :  { %794 = shalt.err (!%p791_p1)
}
 0x35a   :  { %643 = dma.vmem_to_hbm [thread:$0]  %s641_s25, 128, %s1009_s5, [#allocation4]  }
 0x35b   :  { %797 = dma.done.wait [#allocation4], 128  }
 0x35c   :  { %798 = vsyncadd [#allocation4], 4294967168 }
 0x35d   :  { %647 = vsyncpa [#allocation3], 1 }
 0x35e   :  { %648 = vsyncpa [#allocation4], 1 }

</bundles_post_ra>
